<compile_context>
chip_gen: v6e
topology: v6e:2x2x1
jax: 0.10.0
libtpu: 0.0.40
codegen_flags: <defaults>
</compile_context>

<pallas_src>
import jax
import jax.numpy as jnp
import numpy as np
from jax import lax
from jax.experimental import pallas as pl
from jax.experimental.pallas import tpu as pltpu

# ---- small synthetic config (consistent with the module's shapes) ----
B, SQ, SKV = 2, 8, 8          # batch, query seq len, key/value seq len
D_MODEL = 32                  # peft_config.model_config.d_model
N_HEADS = 4
D_KV = D_MODEL // N_HEADS     # inner_dim = N_HEADS * D_KV = D_MODEL
ADAPTER = 16                  # peft_config.adapter_size
EPS = 1e-6                    # T5 layer_norm_epsilon

NQ = B * SQ                   # 16 query rows   (batch folded onto sublanes)
NK = B * SKV                  # 16 key/val rows (batch folded onto sublanes)
HQ = N_HEADS * NQ             # 64 (head, batch, query) score rows


def _t5_cross_attn_adapter_kernel(hid_ref, kv_ref, wq_ref, wkv_ref, wod_ref,
                                  bd_ref, wu_ref, bu_ref, hmask_ref, sbias_ref,
                                  out_ref):
    x = hid_ref[...].astype(jnp.float32)        # (NQ, D)  original hidden (residual)

    # --- T5 RMS layer norm (scale weight pre-folded into Wq) ---
    var = jnp.mean(x * x, axis=-1, keepdims=True)
    xn = x * lax.rsqrt(var + EPS)

    # --- projections: Q, and fused K|V in one matmul (bf16 operands, f32 acc) ---
    q = jnp.dot(xn.astype(jnp.bfloat16), wq_ref[...],
                preferred_element_type=jnp.float32)                       # (NQ, D)
    kvp = jnp.dot(kv_ref[...].astype(jnp.bfloat16), wkv_ref[...],
                  preferred_element_type=jnp.float32)                     # (NK, 2D)
    k_bf = kvp[:, :D_MODEL].astype(jnp.bfloat16)
    v_bf = kvp[:, D_MODEL:].astype(jnp.bfloat16)

    # --- all heads & batches at once (no per-head loop, no transposes) ---
    # Replicate q per head along sublanes and zero the lanes not belonging to
    # that head (static bf16 0/1 mask input); one NT matmul against k then
    # yields all (head, batch, query) score rows.
    hmask = hmask_ref[...]                                                # (HQ, D) bf16
    q_heads = (jnp.broadcast_to(q.astype(jnp.bfloat16)[None],
                                (N_HEADS, NQ, D_MODEL))
               .reshape(HQ, D_MODEL) * hmask)                             # (HQ, D) bf16
    s = lax.dot_general(q_heads, k_bf, (((1,), (1,)), ((), ())),
                        preferred_element_type=jnp.float32)               # (HQ, NK)

    # block-diagonal batch mask as a static additive bias (0 / -1e30)
    s = s + sbias_ref[...]

    # softmax over keys (T5: no 1/sqrt(d_kv) scaling); reciprocal on the EUP
    s = s - jnp.max(s, axis=-1, keepdims=True)
    p = jnp.exp(s)
    p = p * pl.reciprocal(jnp.sum(p, axis=-1, keepdims=True), approx=True)

    # context for all heads at once; keep each head's lanes, sum the per-head
    # row blocks -> heads concatenated along the feature axis (== concat @ ...).
    ctx = jnp.dot(p.astype(jnp.bfloat16), v_bf,
                  preferred_element_type=jnp.float32)                     # (HQ, D)
    ctx = ctx * hmask
    attn = ctx[0:NQ, :]
    for h in range(1, N_HEADS):                                           # static slices
        attn = attn + ctx[h * NQ:(h + 1) * NQ, :]                         # (NQ, D)

    # --- adapter bottleneck; Wo fused into the down projection (Wo @ Wd) ---
    down = jnp.dot(attn.astype(jnp.bfloat16), wod_ref[...],
                   preferred_element_type=jnp.float32) + bd_ref[...]
    down = jnp.maximum(down, 0.0)
    up = jnp.dot(down.astype(jnp.bfloat16), wu_ref[...],
                 preferred_element_type=jnp.float32) + bu_ref[...]

    # dropout == identity (eval); residual is the ORIGINAL (pre-norm) hidden
    out_ref[...] = (up + x).astype(out_ref.dtype)


def prepare_params(params):
    """One-time host-side parameter preparation (numpy; never re-traced per call)."""
    ln_w, wq, wk, wv, wo, wd, bd, wu, bu = (np.asarray(p, np.float32) for p in params)

    wq_fused = ln_w.reshape(-1, 1) * wq            # fold RMS-norm weight into Wq (exact)
    wkv = np.concatenate([wk, wv], axis=1)         # (D, 2D): single K|V projection
    w_od = wo @ wd                                 # (D, A) : Wo @ Wd

    # static masks for the head-replication / batch-in-sublanes trick
    r = np.arange(HQ)
    d = np.arange(D_MODEL)
    hmask = ((r // NQ)[:, None] == (d // D_KV)[None, :]).astype(np.float32)   # (HQ, D)
    c = np.arange(NK)
    sbias = np.where(((r % NQ) // SQ)[:, None] == (c // SKV)[None, :],
                     0.0, -1e30).astype(np.float32)                           # (HQ, NK)

    bf16 = jnp.bfloat16
    return (jnp.asarray(wq_fused, bf16),
            jnp.asarray(wkv, bf16),
            jnp.asarray(w_od, bf16),
            jnp.asarray(bd, jnp.float32),
            jnp.asarray(wu, bf16),
            jnp.asarray(bu, jnp.float32),
            jnp.asarray(hmask, bf16),
            jnp.asarray(sbias, bf16))


def t5_adapter_cross_attention(hidden, kv_states, prepared):
    wq_f, wkv, w_od, bd, wu, bu, hmask, sbias = prepared

    # fold batch onto the sublane axis
    hid2 = hidden.reshape(NQ, D_MODEL)
    kv2 = kv_states.reshape(NK, D_MODEL)

    vmem = lambda: pl.BlockSpec(memory_space=pltpu.MemorySpace.VMEM)

    out2 = pl.pallas_call(
        _t5_cross_attn_adapter_kernel,
        out_shape=jax.ShapeDtypeStruct((NQ, D_MODEL), hidden.dtype),
        # no grid: single-shot kernel, whole (tiny) operands resident in VMEM,
        # no useless double-buffering of grid-invariant weights.
        in_specs=[vmem() for _ in range(10)],
        out_specs=vmem(),
        cost_estimate=pl.CostEstimate(flops=262_144, transcendentals=1_104,
                                      bytes_accessed=20_672),
    )(hid2, kv2, wq_f, wkv, w_od, bd, wu, bu, hmask, sbias)
    return out2.reshape(B, SQ, D_MODEL)


def _reference(hidden, kv_states, params):
    """Pure-f32 reference with the module's original (unfused) parameters."""
    ln_w, wq, wk, wv, wo, wd, bd, wu, bu = params
    x = hidden.astype(jnp.float32)
    kv = kv_states.astype(jnp.float32)
    var = jnp.mean(x * x, axis=-1, keepdims=True)
    xn = x * lax.rsqrt(var + EPS) * ln_w[0]
    q = (xn @ wq).reshape(B, SQ, N_HEADS, D_KV)
    k = (kv @ wk).reshape(B, SKV, N_HEADS, D_KV)
    v = (kv @ wv).reshape(B, SKV, N_HEADS, D_KV)
    s = jnp.einsum("bqhd,bkhd->bhqk", q, k)
    p = jax.nn.softmax(s, axis=-1)
    ctx = jnp.einsum("bhqk,bkhd->bqhd", p, v).reshape(B, SQ, N_HEADS * D_KV)
    attn = ctx @ wo
    down = jnp.maximum(attn @ wd + bd[0], 0.0)
    up = down @ wu + bu[0]
    return up + x


if __name__ == "__main__":
    key = jax.random.PRNGKey(0)
    ks = jax.random.split(key, 12)

    hidden = jax.random.normal(ks[0], (B, SQ, D_MODEL), jnp.float32)
    kv_states = jax.random.normal(ks[1], (B, SKV, D_MODEL), jnp.float32)

    # deterministic synthetic parameters
    ln_w = 1.0 + 0.05 * jax.random.normal(ks[2], (1, D_MODEL), jnp.float32)
    wq = 0.1 * jax.random.normal(ks[3], (D_MODEL, D_MODEL), jnp.float32)
    wk = 0.1 * jax.random.normal(ks[4], (D_MODEL, D_MODEL), jnp.float32)
    wv = 0.1 * jax.random.normal(ks[5], (D_MODEL, D_MODEL), jnp.float32)
    wo = 0.1 * jax.random.normal(ks[6], (D_MODEL, D_MODEL), jnp.float32)
    wd = 0.1 * jax.random.normal(ks[7], (D_MODEL, ADAPTER), jnp.float32)
    bd = 0.01 * jax.random.normal(ks[8], (1, ADAPTER), jnp.float32)
    wu = 0.1 * jax.random.normal(ks[9], (ADAPTER, D_MODEL), jnp.float32)
    bu = 0.01 * jax.random.normal(ks[10], (1, D_MODEL), jnp.float32)
    params = (ln_w, wq, wk, wv, wo, wd, bd, wu, bu)

    prepared = prepare_params(params)          # one-time host-side weight fusion
    fwd = jax.jit(t5_adapter_cross_attention)

    out = jax.block_until_ready(fwd(hidden, kv_states, prepared))
    ref = jax.block_until_ready(_reference(hidden, kv_states, params))

    assert out.shape == (B, SQ, D_MODEL)
    # tolerance reflects bf16 MXU operands (+ approx EUP reciprocal) vs f32 reference
    np.testing.assert_allclose(np.asarray(out), np.asarray(ref),
                               rtol=2e-2, atol=2e-2)

    print("KERNEL_OK")
</pallas_src>

<mosaic_0001>
module attributes {stable_mosaic.version = 11 : i64} {
  func.func @_t5_cross_attn_adapter_kernel(%arg0: memref<16x32xf32, #tpu.memory_space<vmem>>, %arg1: memref<16x32xf32, #tpu.memory_space<vmem>>, %arg2: memref<32x32xbf16, #tpu.memory_space<vmem>>, %arg3: memref<32x64xbf16, #tpu.memory_space<vmem>>, %arg4: memref<32x16xbf16, #tpu.memory_space<vmem>>, %arg5: memref<1x16xf32, #tpu.memory_space<vmem>>, %arg6: memref<16x32xbf16, #tpu.memory_space<vmem>>, %arg7: memref<1x32xf32, #tpu.memory_space<vmem>>, %arg8: memref<64x32xbf16, #tpu.memory_space<vmem>>, %arg9: memref<64x16xbf16, #tpu.memory_space<vmem>>, %arg10: memref<16x32xf32, #tpu.memory_space<vmem>>) attributes {dimension_semantics = [], scalar_prefetch = 0 : i64, scratch_operands = 0 : i64, tpu.core_type = #tpu.core_type<tc>} {
    %c0 = arith.constant 0 : index
    %c0_0 = arith.constant 0 : index
    %0 = vector.load %arg0[%c0, %c0_0] : memref<16x32xf32, #tpu.memory_space<vmem>>, vector<16x32xf32>
    %1 = arith.mulf %0, %0 : vector<16x32xf32>
    %cst = arith.constant dense<0.000000e+00> : vector<16xf32>
    %2 = vector.multi_reduction <add>, %1, %cst [1] : vector<16x32xf32> to vector<16xf32>
    %3 = vector.shape_cast %2 : vector<16xf32> to vector<16x1xf32>
    %cst_1 = arith.constant 3.200000e+01 : f32
    %4 = vector.broadcast %cst_1 : f32 to vector<16x1xf32>
    %5 = arith.divf %3, %4 : vector<16x1xf32>
    %cst_2 = arith.constant 9.99999997E-7 : f32
    %6 = vector.broadcast %cst_2 : f32 to vector<16x1xf32>
    %7 = arith.addf %5, %6 : vector<16x1xf32>
    %8 = math.rsqrt %7 : vector<16x1xf32>
    %9 = vector.broadcast %8 : vector<16x1xf32> to vector<16x32xf32>
    %10 = arith.mulf %0, %9 : vector<16x32xf32>
    %11 = arith.truncf %10 : vector<16x32xf32> to vector<16x32xbf16>
    %c0_3 = arith.constant 0 : index
    %c0_4 = arith.constant 0 : index
    %12 = vector.load %arg2[%c0_3, %c0_4] : memref<32x32xbf16, #tpu.memory_space<vmem>>, vector<32x32xbf16>
    %cst_5 = arith.constant dense<0.000000e+00> : vector<16x32xf32>
    %13 = tpu.matmul %11, %12, %cst_5 {dimension_numbers = #tpu.dot_dimension_numbers<[1], [0], [0], [1], [0, 0, 1, 1], [], []>} : vector<16x32xbf16>, vector<32x32xbf16>, vector<16x32xf32> -> vector<16x32xf32>
    %c0_6 = arith.constant 0 : index
    %c0_7 = arith.constant 0 : index
    %14 = vector.load %arg1[%c0_6, %c0_7] : memref<16x32xf32, #tpu.memory_space<vmem>>, vector<16x32xf32>
    %15 = arith.truncf %14 : vector<16x32xf32> to vector<16x32xbf16>
    %c0_8 = arith.constant 0 : index
    %c0_9 = arith.constant 0 : index
    %16 = vector.load %arg3[%c0_8, %c0_9] : memref<32x64xbf16, #tpu.memory_space<vmem>>, vector<32x64xbf16>
    %cst_10 = arith.constant dense<0.000000e+00> : vector<16x64xf32>
    %17 = tpu.matmul %15, %16, %cst_10 {dimension_numbers = #tpu.dot_dimension_numbers<[1], [0], [0], [1], [0, 0, 1, 1], [], []>} : vector<16x32xbf16>, vector<32x64xbf16>, vector<16x64xf32> -> vector<16x64xf32>
    %18 = vector.extract_strided_slice %17 {offsets = [0, 0], sizes = [16, 32], strides = [1, 1]} : vector<16x64xf32> to vector<16x32xf32>
    %19 = arith.truncf %18 : vector<16x32xf32> to vector<16x32xbf16>
    %20 = vector.extract_strided_slice %17 {offsets = [0, 32], sizes = [16, 32], strides = [1, 1]} : vector<16x64xf32> to vector<16x32xf32>
    %21 = arith.truncf %20 : vector<16x32xf32> to vector<16x32xbf16>
    %c0_11 = arith.constant 0 : index
    %c0_12 = arith.constant 0 : index
    %22 = vector.load %arg8[%c0_11, %c0_12] : memref<64x32xbf16, #tpu.memory_space<vmem>>, vector<64x32xbf16>
    %23 = arith.truncf %13 : vector<16x32xf32> to vector<16x32xbf16>
    %24 = vector.shape_cast %23 : vector<16x32xbf16> to vector<1x16x32xbf16>
    %25 = vector.shape_cast %24 : vector<1x16x32xbf16> to vector<1x16x32xbf16>
    %26 = vector.broadcast %25 : vector<1x16x32xbf16> to vector<4x16x32xbf16>
    %27 = vector.shape_cast %26 : vector<4x16x32xbf16> to vector<64x32xbf16>
    %28 = arith.mulf %27, %22 : vector<64x32xbf16>
    %cst_13 = arith.constant dense<0.000000e+00> : vector<64x16xf32>
    %29 = tpu.matmul %28, %19, %cst_13 {dimension_numbers = #tpu.dot_dimension_numbers<[1], [1], [0], [0], [0, 0, 1, 0], [], []>} : vector<64x32xbf16>, vector<16x32xbf16>, vector<64x16xf32> -> vector<64x16xf32>
    %c0_14 = arith.constant 0 : index
    %c0_15 = arith.constant 0 : index
    %30 = vector.load %arg9[%c0_14, %c0_15] : memref<64x16xbf16, #tpu.memory_space<vmem>>, vector<64x16xbf16>
    %31 = arith.extf %30 : vector<64x16xbf16> to vector<64x16xf32>
    %32 = arith.addf %29, %31 : vector<64x16xf32>
    %cst_16 = arith.constant dense<0xFF800000> : vector<64xf32>
    %33 = vector.multi_reduction <maximumf>, %32, %cst_16 [1] : vector<64x16xf32> to vector<64xf32>
    %34 = vector.shape_cast %33 : vector<64xf32> to vector<64x1xf32>
    %35 = vector.broadcast %34 : vector<64x1xf32> to vector<64x16xf32>
    %36 = arith.subf %32, %35 : vector<64x16xf32>
    %37 = math.exp %36 : vector<64x16xf32>
    %cst_17 = arith.constant dense<0.000000e+00> : vector<64xf32>
    %38 = vector.multi_reduction <add>, %37, %cst_17 [1] : vector<64x16xf32> to vector<64xf32>
    %39 = vector.shape_cast %38 : vector<64xf32> to vector<64x1xf32>
    %40 = tpu.reciprocal %39 {approx = true} : vector<64x1xf32> -> vector<64x1xf32>
    %41 = vector.broadcast %40 : vector<64x1xf32> to vector<64x16xf32>
    %42 = arith.mulf %37, %41 : vector<64x16xf32>
    %43 = arith.truncf %42 : vector<64x16xf32> to vector<64x16xbf16>
    %cst_18 = arith.constant dense<0.000000e+00> : vector<64x32xf32>
    %44 = tpu.matmul %43, %21, %cst_18 {dimension_numbers = #tpu.dot_dimension_numbers<[1], [0], [0], [1], [0, 0, 1, 1], [], []>} : vector<64x16xbf16>, vector<16x32xbf16>, vector<64x32xf32> -> vector<64x32xf32>
    %45 = arith.extf %22 : vector<64x32xbf16> to vector<64x32xf32>
    %46 = arith.mulf %44, %45 : vector<64x32xf32>
    %47 = vector.extract_strided_slice %46 {offsets = [0, 0], sizes = [16, 32], strides = [1, 1]} : vector<64x32xf32> to vector<16x32xf32>
    %48 = vector.extract_strided_slice %46 {offsets = [16, 0], sizes = [16, 32], strides = [1, 1]} : vector<64x32xf32> to vector<16x32xf32>
    %49 = arith.addf %47, %48 : vector<16x32xf32>
    %50 = vector.extract_strided_slice %46 {offsets = [32, 0], sizes = [16, 32], strides = [1, 1]} : vector<64x32xf32> to vector<16x32xf32>
    %51 = arith.addf %49, %50 : vector<16x32xf32>
    %52 = vector.extract_strided_slice %46 {offsets = [48, 0], sizes = [16, 32], strides = [1, 1]} : vector<64x32xf32> to vector<16x32xf32>
    %53 = arith.addf %51, %52 : vector<16x32xf32>
    %54 = arith.truncf %53 : vector<16x32xf32> to vector<16x32xbf16>
    %c0_19 = arith.constant 0 : index
    %c0_20 = arith.constant 0 : index
    %55 = vector.load %arg4[%c0_19, %c0_20] : memref<32x16xbf16, #tpu.memory_space<vmem>>, vector<32x16xbf16>
    %cst_21 = arith.constant dense<0.000000e+00> : vector<16x16xf32>
    %56 = tpu.matmul %54, %55, %cst_21 {dimension_numbers = #tpu.dot_dimension_numbers<[1], [0], [0], [1], [0, 0, 1, 1], [], []>} : vector<16x32xbf16>, vector<32x16xbf16>, vector<16x16xf32> -> vector<16x16xf32>
    %c0_22 = arith.constant 0 : index
    %c0_23 = arith.constant 0 : index
    %57 = vector.load %arg5[%c0_22, %c0_23] : memref<1x16xf32, #tpu.memory_space<vmem>>, vector<1x16xf32>
    %58 = vector.broadcast %57 : vector<1x16xf32> to vector<16x16xf32>
    %59 = arith.addf %56, %58 : vector<16x16xf32>
    %cst_24 = arith.constant 0.000000e+00 : f32
    %60 = vector.broadcast %cst_24 : f32 to vector<16x16xf32>
    %61 = arith.maximumf %59, %60 : vector<16x16xf32>
    %62 = arith.truncf %61 : vector<16x16xf32> to vector<16x16xbf16>
    %c0_25 = arith.constant 0 : index
    %c0_26 = arith.constant 0 : index
    %63 = vector.load %arg6[%c0_25, %c0_26] : memref<16x32xbf16, #tpu.memory_space<vmem>>, vector<16x32xbf16>
    %cst_27 = arith.constant dense<0.000000e+00> : vector<16x32xf32>
    %64 = tpu.matmul %62, %63, %cst_27 {dimension_numbers = #tpu.dot_dimension_numbers<[1], [0], [0], [1], [0, 0, 1, 1], [], []>} : vector<16x16xbf16>, vector<16x32xbf16>, vector<16x32xf32> -> vector<16x32xf32>
    %c0_28 = arith.constant 0 : index
    %c0_29 = arith.constant 0 : index
    %65 = vector.load %arg7[%c0_28, %c0_29] : memref<1x32xf32, #tpu.memory_space<vmem>>, vector<1x32xf32>
    %66 = vector.broadcast %65 : vector<1x32xf32> to vector<16x32xf32>
    %67 = arith.addf %64, %66 : vector<16x32xf32>
    %68 = arith.addf %67, %0 : vector<16x32xf32>
    %c0_30 = arith.constant 0 : index
    %c0_31 = arith.constant 0 : index
    %69 = vector.load %arg10[%c0_30, %c0_31] : memref<16x32xf32, #tpu.memory_space<vmem>>, vector<16x32xf32>
    tpu.vector_store %arg10[%c0_30, %c0_31], %68 {strides = array<i32>} : memref<16x32xf32, #tpu.memory_space<vmem>>, vector<16x32xf32>,
    return
  }
}

</mosaic_0001>

<bundles_post_ra>
// kernel: t5_adapter_cross_attention.1
= control target key start
LH: loop header
LB: loop body
LE: loop exit
PB: predicated region body
PF: predicated region fallthrough
CT: control target
= control target key end

     0   :  { %vm41_vm0 = vcmask 261120   ;;  %s1069_s0 = inlined_call_operand.vmem [shape: f32[16,32], index: 0, kind: input, shape index: {}]   ;;  %s1070_s1 = inlined_call_operand.vmem [shape: f32[16,32], index: 1, kind: input, shape index: {}]   ;;  %s1071_s2 = inlined_call_operand.vmem [shape: bf16[32,32], index: 2, kind: input, shape index: {}]   ;;  %s1072_s3 = inlined_call_operand.vmem [shape: bf16[32,64], index: 3, kind: input, shape index: {}]   ;;  %s1073_s4 = inlined_call_operand.vmem [shape: bf16[32,16], index: 4, kind: input, shape index: {}]   ;;  %s1074_s5 = inlined_call_operand.vmem [shape: f32[1,16], index: 5, kind: input, shape index: {}]   ;;  %s1075_s6 = inlined_call_operand.vmem [shape: bf16[16,32], index: 6, kind: input, shape index: {}]   ;;  %s1076_s7 = inlined_call_operand.vmem [shape: f32[1,32], index: 7, kind: input, shape index: {}]   ;;  %s1077_s8 = inlined_call_operand.vmem [shape: bf16[64,32], index: 8, kind: input, shape index: {}]   ;;  %s1078_s9 = inlined_call_operand.vmem [shape: bf16[64,16], index: 9, kind: input, shape index: {}]   ;;  %s1079_s10 = inlined_call_operand.hbm [shape: f32[16,32], index: 10, kind: output, shape index: {}]  }
   0x1   :  { %v920_v0 = vld [vmem:[%s1069_s0] sm:$0xff]  ;;  %v925_v1 = vld [vmem:[%s1069_s0 + $0x8] sm:$0xff] }
   0x2   :  { %v39_v2 = vmul.f32 %v920_v0, %v920_v0  ;;  %v40_v3 = vmul.f32 %v925_v1, %v925_v1 }
   0x4   :  { %v42_v4 = vsel %vm41_vm0, %v39_v2, 0.0  ;;  %v45_v5 = vsel %vm41_vm0, %v40_v3, 0.0 }
   0x5   :  { %43 = vadd.xlane.f32.xlu0 %v42_v4 }
   0x6   :  { %15 = vsyncpa [#allocation3], 0  ;;  %v783_v6 = vld [vmem:[%s1072_s3 + $0x8] sm:$0xff]   ;;  %v856_v7 = vmov 0.0   ;;  %v784_v8 = vld [vmem:[%s1072_s3] sm:$0xff]   ;;  %vm857_vm1 = vmmov 0  }
   0x7   :  { %734 = vmatprep.subr.bf16.mxu1 %v856_v7  ;;  %726 = vmatprep.subr.bf16.mxu0 %v856_v7  ;;  %v118_v9 = vld [vmem:[%s1070_s1] sm:$0xff]  ;;  %v119_v10 = vld [vmem:[%s1070_s1 + $0x8] sm:$0xff]  ;;  %v983_v35 = vld [vmem:[%s1077_s8 + $0x10] sm:$0xff]   ;;  %vm315_vm2 = vcmask 130048  }
   0x8   :  { %735 = vmatpush3.bf16.msra.mxu1 %v783_v6  ;;  %738 = vmatprep.mubr.msk.bf16.mxu1 %vm857_vm1, %v856_v7  ;;  %v785_v11 = vld [vmem:[%s1071_s2 + $0x8] sm:$0xff]   ;;  %v120_v12 = vpack.c.bf16 %v119_v10, %v118_v9  ;;  %v786_v13 = vld [vmem:[%s1071_s2] sm:$0xff]   ;;  %v992_v42 = vld [vmem:[%s1077_s8 + $0x18] sm:$0xff]  }
   0x9   :  { %46 = vadd.xlane.f32.xlu0 %v45_v5  ;;  %736 = vmatprep.subr.bf16.mxu1 %v856_v7  ;;  %v973_v32 = vld [vmem:[%s1077_s8 + $0x8] sm:$0xff]   ;;  %v978_v33 = vld [vmem:[%s1077_s8] sm:$0xff]   ;;  %v703_v55 = vld [vmem:[%s1078_s9 + $0x10] sm:$0xff]  }
   0xa   :  { %730 = vmatprep.mubr.msk.bf16.mxu0 %vm857_vm1, %v856_v7  ;;  %727 = vmatpush3.bf16.msra.mxu0 %v785_v11  ;;  %v702_v44 = vld [vmem:[%s1078_s9 + $0x8] sm:$0xff]   ;;  %v687_v45 = vld [vmem:[%s1078_s9] sm:$0xff]   ;;  %v704_v59 = vld [vmem:[%s1078_s9 + $0x18] sm:$0xff]   ;;  %v696_v61 = vunpack.c.l.bf16 %v703_v55  ;;  %v697_v6 = vunpack.c.h.bf16 %v703_v55  ;;  %s858_s9 = smov 96  }
   0xb   :  { %728 = vmatprep.subr.bf16.mxu0 %v856_v7  ;;  %v692_v46 = vunpack.c.l.bf16 %v702_v44  ;;  %v688_v47 = vunpack.c.l.bf16 %v687_v45  ;;  %v689_v53 = vunpack.c.h.bf16 %v687_v45  ;;  %v693_v56 = vunpack.c.h.bf16 %v702_v44 }
   0xc   :  { %737 = vmatpush3.bf16.msra.mxu1 %v784_v8  ;;  %v700_v2 = vunpack.c.l.bf16 %v704_v59  ;;  %v701_v10 = vunpack.c.h.bf16 %v704_v59 }
   0xe   :  { %729 = vmatpush3.bf16.msra.mxu0 %v786_v13 }
   0xf   :  { %739 = vmatmul.mubr.msk.bf16.vlgmr.msra.gmra.mxu1 %vm41_vm0, %v120_v12 }
  0x8e   :  { %v44_v14 = vpop.xlane.xlu0 %43 }
  0x8f   :  { %v49_v15 = vmul.f32 0.03125, %v44_v14 }
  0x91   :  { %v51_v16 = vadd.f32 1e-06, %v49_v15 }
  0x92   :  { %v47_v17 = vpop.xlane.xlu0 %46 }
  0x93   :  { %v50_v18 = vmul.f32 0.03125, %v47_v17  ;;  %798 = vrsqrt.f32 %v51_v16 }
  0x95   :  { %v52_v19 = vadd.f32 1e-06, %v50_v18 }
  0x97   :  { %800 = vrsqrt.f32 %v52_v19 }
  0xa0   :  { %v799_v20 = vpop.eup %798 }
  0xa1   :  { %v55_v22 = vmul.f32 %v799_v20, %v920_v0 }
  0xa4   :  { %v801_v21 = vpop.eup %800 }
  0xa5   :  { %v56_v23 = vmul.f32 %v801_v21, %v925_v1 }
  0xa7   :  { %v57_v24 = vpack.c.bf16 %v56_v23, %v55_v22 }
  0xa9   :  { %731 = vmatmul.mubr.msk.bf16.vlgmr.msra.gmra.mxu0 %vm41_vm0, %v57_v24 }
  0xcf   :  { %v174_v25 = vpop.f32.mrf.mxu1 }
  0xd1   :  { %v740_v26 = vpop.f32.mrf.mxu1 }
  0xd3   :  { %v177_v27 = vpop.f32.mrf.mxu1 }
  0xd4   :  { %v963_v28 = vpack.c.bf16 %v177_v27, %v174_v25 }
  0xd5   :  { %v741_v29 = vpop.f32.mrf.mxu1 }
  0xd6   :  { %776 = vmatprep.subr.msk.bf16.mxu0 %vm41_vm0, %v963_v28  ;;  %v248_v30 = vsel %vm41_vm0, %v963_v28, 0 }
  0xd7   :  { %743 = vmatpush3.bf16.xpose.msra.mxu0 %v248_v30 }
  0xd8   :  { %762 = vmatprep.subr.bf16.mxu0 %v856_v7 }
 0x169   :  { %v111_v31 = vpop.f32.mrf.mxu0 }
 0x16b   :  { %v732_v34 = vpop.f32.mrf.mxu0 }
 0x16d   :  { %v114_v36 = vpop.f32.mrf.mxu0 }
 0x16e   :  { %v190_v37 = vpack.c.bf16 %v114_v36, %v111_v31 }
 0x16f   :  { %v733_v38 = vpop.f32.mrf.mxu0 }
 0x170   :  { %v216_v39 = vmul.bf16 %v190_v37, %v973_v32  ;;  %v215_v40 = vmul.bf16 %v190_v37, %v978_v33  ;;  %v217_v41 = vmul.bf16 %v190_v37, %v983_v35  ;;  %v218_v43 = vmul.bf16 %v190_v37, %v992_v42 }
 0x172   :  { %744 = vmatprep.mubr.msk.bf16.mxu0 %vm41_vm0, %v215_v40 }
 0x173   :  { %745 = vmatmul.mubr.msk.bf16.vlgmr.msra.gmra.mxu0 %vm41_vm0, %v216_v39 }
 0x174   :  { %748 = vmatprep.mubr.msk.bf16.mxu0 %vm41_vm0, %v217_v41 }
 0x17b   :  { %749 = vmatmul.mubr.msk.bf16.gmra.mxu0 %vm41_vm0, %v218_v43 }
 0x17c   :  { %766 = vmatprep.mubr.msk.bf16.mxu0 %vm857_vm1, %v856_v7 }
 0x233   :  { %v746_v48 = vpop.f32.mrf.mxu0 }
 0x234   :  { %v293_v49 = vadd.f32 %v746_v48, %v692_v46 }
 0x235   :  { %v284_v50 = vpop.f32.mrf.mxu0 }
 0x236   :  { %v285_v51 = vadd.f32 %v688_v47, %v284_v50  ;;  %v322_v52 = vsel %vm315_vm2, %v293_v49, -inf }
 0x237   :  { %323 = vmax.xlane.f32.xlu0 %v322_v52  ;;  %v747_v54 = vpop.f32.mrf.mxu0 }
 0x238   :  { %v316_v57 = vsel %vm315_vm2, %v285_v51, -inf  ;;  %v296_v63 = vadd.f32 %v747_v54, %v693_v56 }
 0x239   :  { %v287_v58 = vpop.f32.mrf.mxu0  ;;  %317 = vmax.xlane.f32.xlu1 %v316_v57 }
 0x23a   :  { %v288_v60 = vadd.f32 %v689_v53, %v287_v58  ;;  %v325_v12 = vsel %vm315_vm2, %v296_v63, -inf }
 0x23b   :  { %v750_v62 = vpop.f32.mrf.mxu0 }
 0x23c   :  { %v319_v3 = vsel %vm315_vm2, %v288_v60, -inf  ;;  %v309_v9 = vadd.f32 %v750_v62, %v700_v2 }
 0x23d   :  { %v300_v4 = vpop.f32.mrf.mxu0  ;;  %320 = vmax.xlane.f32.xlu1 %v319_v3 }
 0x23e   :  { %v301_v5 = vadd.f32 %v696_v61, %v300_v4  ;;  %v334_v16 = vsel %vm315_vm2, %v309_v9, -inf }
 0x23f   :  { %v751_v8 = vpop.f32.mrf.mxu0 }
 0x240   :  { %v328_v11 = vsel %vm315_vm2, %v301_v5, -inf  ;;  %v312_v15 = vadd.f32 %v751_v8, %v701_v10 }
 0x241   :  { %v303_v13 = vpop.f32.mrf.mxu0  ;;  %329 = vmax.xlane.f32.xlu0 %v328_v11  ;;  %326 = vmax.xlane.f32.xlu1 %v325_v12 }
 0x242   :  { %v304_v14 = vadd.f32 %v697_v6, %v303_v13  ;;  %v337_v18 = vsel %vm315_vm2, %v312_v15, -inf }
 0x244   :  { %v331_v17 = vsel %vm315_vm2, %v304_v14, -inf }
 0x245   :  { %335 = vmax.xlane.f32.xlu0 %v334_v16  ;;  %332 = vmax.xlane.f32.xlu1 %v331_v17 }
 0x249   :  { %338 = vmax.xlane.f32.xlu1 %v337_v18 }
 0x2c0   :  { %v324_v19 = vpop.xlane.xlu0 %323 }
 0x2c1   :  { %v342_v20 = vsub.f32 %v293_v49, %v324_v19 }
 0x2c2   :  { %v318_v21 = vpop.xlane.xlu1 %317 }
 0x2c3   :  { %v352_v22 = vmul.f32 1.442695, %v342_v20  ;;  %v340_v23 = vsub.f32 %v285_v51, %v318_v21 }
 0x2c5   :  { %802 = vpow2.f32 %v352_v22  ;;  %v348_v24 = vmul.f32 1.442695, %v340_v23 }
 0x2c6   :  { %v321_v25 = vpop.xlane.xlu1 %320 }
 0x2c7   :  { %804 = vpow2.f32 %v348_v24  ;;  %v341_v26 = vsub.f32 %v288_v60, %v321_v25 }
 0x2c9   :  { %v350_v27 = vmul.f32 1.442695, %v341_v26 }
 0x2ca   :  { %v330_v29 = vpop.xlane.xlu0 %329  ;;  %v327_v30 = vpop.xlane.xlu1 %326 }
 0x2cb   :  { %806 = vpow2.f32 %v350_v27  ;;  %v343_v31 = vsub.f32 %v296_v63, %v327_v30  ;;  %v344_v34 = vsub.f32 %v301_v5, %v330_v29 }
 0x2cd   :  { %v354_v36 = vmul.f32 1.442695, %v343_v31  ;;  %v356_v41 = vmul.f32 1.442695, %v344_v34  ;;  %v791_v34 = vld [vmem:[%s1073_s4 + $0x8] sm:$0xff]  }
 0x2ce   :  { %v336_v37 = vpop.xlane.xlu0 %335  ;;  %v333_v38 = vpop.xlane.xlu1 %332  ;;  %763 = vmatpush3.bf16.msra.mxu0 %v791_v34 }
 0x2cf   :  { %v346_v39 = vsub.f32 %v309_v9, %v336_v37  ;;  %v345_v40 = vsub.f32 %v304_v14, %v333_v38  ;;  %808 = vpow2.f32 %v354_v36  ;;  %764 = vmatprep.subr.bf16.mxu0 %v856_v7  ;;  %v792_v36 = vld [vmem:[%s1073_s4] sm:$0xff]  }
 0x2d0   :  { %v793_v37 = vld [vmem:[%s1075_s6] sm:$0xff]  }
 0x2d1   :  { %v360_v43 = vmul.f32 1.442695, %v346_v39  ;;  %v358_v44 = vmul.f32 1.442695, %v345_v40 }
 0x2d2   :  { %v803_v45 = vpop.eup %802  ;;  %v339_v46 = vpop.xlane.xlu1 %338  ;;  %765 = vmatpush3.bf16.msra.mxu0 %v792_v36 }
 0x2d3   :  { %810 = vpow2.f32 %v360_v43  ;;  %v347_v47 = vsub.f32 %v312_v15, %v339_v46  ;;  %v370_v48 = vsel %vm315_vm2, %v803_v45, 0.0 }
 0x2d4   :  { %v805_v49 = vpop.eup %804  ;;  %812 = vpow2.f32 %v358_v44  ;;  %371 = vadd.xlane.f32.xlu0 %v370_v48  ;;  %v491_v44 = vunpack.c.l.bf16 %v973_v32  ;;  %v492_v48 = vunpack.c.h.bf16 %v973_v32 }
 0x2d5   :  { %814 = vpow2.f32 %v356_v41  ;;  %v362_v50 = vmul.f32 1.442695, %v347_v47  ;;  %v364_v51 = vsel %vm315_vm2, %v805_v49, 0.0  ;;  %v489_v41 = vunpack.c.l.bf16 %v978_v33 }
 0x2d7   :  { %816 = vpow2.f32 %v362_v50 }
 0x2d8   :  { %v807_v52 = vpop.eup %806  ;;  %365 = vadd.xlane.f32.xlu0 %v364_v51 }
 0x2d9   :  { %v367_v53 = vsel %vm315_vm2, %v807_v52, 0.0 }
 0x2da   :  { %368 = vadd.xlane.f32.xlu1 %v367_v53  ;;  %v494_v53 = vunpack.c.h.bf16 %v983_v35 }
 0x2dc   :  { %v809_v54 = vpop.eup %808 }
 0x2dd   :  { %v373_v55 = vsel %vm315_vm2, %v809_v54, 0.0 }
 0x2de   :  { %374 = vadd.xlane.f32.xlu1 %v373_v55 }
 0x2e0   :  { %v811_v56 = vpop.eup %810 }
 0x2e1   :  { %v813_v57 = vpop.eup %812  ;;  %v382_v58 = vsel %vm315_vm2, %v811_v56, 0.0 }
 0x2e2   :  { %v815_v59 = vpop.eup %814  ;;  %383 = vadd.xlane.f32.xlu0 %v382_v58  ;;  %v379_v60 = vsel %vm315_vm2, %v813_v57, 0.0  ;;  %v496_v58 = vunpack.c.h.bf16 %v992_v42 }
 0x2e3   :  { %380 = vadd.xlane.f32.xlu1 %v379_v60  ;;  %v376_v62 = vsel %vm315_vm2, %v815_v59, 0.0 }
 0x2e4   :  { %v817_v61 = vpop.eup %816 }
 0x2e5   :  { %v385_v63 = vsel %vm315_vm2, %v817_v61, 0.0 }
 0x2e6   :  { %377 = vadd.xlane.f32.xlu0 %v376_v62 }
 0x2e7   :  { %386 = vadd.xlane.f32.xlu1 %v385_v63 }
 0x2fc   :  { %409 = vrot.lane.b32.xlu0 %v963_v28, %s858_s9 }
 0x35d   :  { %v372_v2 = vpop.xlane.xlu0 %371 }
 0x361   :  { %v366_v3 = vpop.xlane.xlu0 %365 }
 0x362   :  { %818 = vrcp.f32 %v366_v3 }
 0x363   :  { %v369_v4 = vpop.xlane.xlu1 %368 }
 0x364   :  { %820 = vrcp.f32 %v369_v4 }
 0x365   :  { %822 = vrcp.f32 %v372_v2 }
 0x367   :  { %v375_v5 = vpop.xlane.xlu1 %374 }
 0x368   :  { %824 = vrcp.f32 %v375_v5 }
 0x36b   :  { %v384_v6 = vpop.xlane.xlu0 %383 }
 0x36c   :  { %v381_v8 = vpop.xlane.xlu1 %380 }
 0x36d   :  { %826 = vrcp.f32 %v381_v8 }
 0x36e   :  { %828 = vrcp.f32 %v384_v6 }
 0x36f   :  { %v819_v9 = vpop.eup %818  ;;  %v378_v10 = vpop.xlane.xlu0 %377 }
 0x370   :  { %830 = vrcp.f32 %v378_v10  ;;  %v387_v11 = vpop.xlane.xlu1 %386  ;;  %v396_v13 = vmul.f32 %v819_v9, %v805_v49 }
 0x371   :  { %v821_v12 = vpop.eup %820  ;;  %832 = vrcp.f32 %v387_v11 }
 0x372   :  { %v397_v28 = vmul.f32 %v821_v12, %v807_v52  ;;  %v823_v15 = vpop.eup %822 }
 0x373   :  { %v410_v14 = vpop.permute.xlu0 %409  ;;  %v398_v18 = vmul.f32 %v823_v15, %v803_v45  ;;  %v493_v45 = vunpack.c.l.bf16 %v983_v35  ;;  %v679_v35 = vld [vmem:[%s1074_s5] ss:$0 sm:$0xff]  ;;  %s859_s5 = smov [#allocation2]  }
 0x374   :  { %752 = vmatprep.subr.bf16.mxu1 %v410_v14  ;;  %v404_v16 = vpack.c.bf16 %v397_v28, %v396_v13  ;;  %v683_v28 = vld [vmem:[%s1076_s7] ss:$0 sm:$0xff]  ;;  %s650_s26 = sshll.u32 %s859_s5, 4  ;;  %s651_s26 = int_to_ptr.vmem [resolvable:$true] %s650_s26 }
 0x375   :  { %753 = vmatpush3.bf16.msra.mxu1 %v410_v14  ;;  %v825_v17 = vpop.eup %824  ;;  %s834_s1 = scalar_lea.vmem %s651_s26, 256  ;;  %p839_p1 = scmp.lt.s32.totalorder %s651_s26, %s651_s26 }
 0x376   :  { %754 = vmatprep.mubr.msk.bf16.mxu1 %vm315_vm2, %v404_v16  ;;  %770 = vmatprep.subr.bf16.mxu1 %v856_v7  ;;  %v399_v19 = vmul.f32 %v825_v17, %v809_v54  ;;  %p835_p0 = scmp.ne.s32.totalorder %s651_s26, %s834_s1  ;;  %p840_p2 = scmp.lt.s32.totalorder %s834_s1, %s834_s1 }
 0x378   :  { %v405_v20 = vpack.c.bf16 %v399_v19, %v398_v18  ;;  %p841_p3 = por %p840_p2, %p839_p1 }
 0x37a   :  { %v827_v21 = vpop.eup %826  ;;  %755 = vmatmul.mubr.msk.bf16.vlgmr.msra.gmra.mxu1 %vm315_vm2, %v405_v20  ;;  %p842_p4 = pnand %p841_p3, %p835_p0 }
 0x37b   :  { %v829_v22 = vpop.eup %828  ;;  %v401_v26 = vmul.f32 %v827_v21, %v813_v57  ;;  %771 = vmatpush3.bf16.msra.mxu1 %v793_v37  ;;  %v495_v57 = vunpack.c.l.bf16 %v992_v42 }
 0x37c   :  { %v402_v27 = vmul.f32 %v829_v22, %v811_v56 }
 0x37d   :  { %v831_v23 = vpop.eup %830 }
 0x37e   :  { %v833_v24 = vpop.eup %832  ;;  %v400_v25 = vmul.f32 %v831_v23, %v815_v59 }
 0x37f   :  { %v403_v29 = vmul.f32 %v833_v24, %v817_v61 }
 0x380   :  { %v406_v30 = vpack.c.bf16 %v401_v26, %v400_v25 }
 0x381   :  { %v407_v31 = vpack.c.bf16 %v403_v29, %v402_v27 }
 0x382   :  { %758 = vmatprep.mubr.msk.bf16.mxu1 %vm315_vm2, %v406_v30 }
 0x383   :  { %759 = vmatmul.mubr.msk.bf16.gmra.mxu1 %vm315_vm2, %v407_v31 }
 0x384   :  { %772 = vmatprep.mubr.msk.bf16.mxu1 %vm857_vm1, %v856_v7  ;;  %v490_v7 = vunpack.c.h.bf16 %v978_v33 }
 0x43a   :  { %v756_v38 = vpop.f32.mrf.mxu1 }
 0x43b   :  { %v499_v50 = vmul.f32 %v756_v38, %v491_v44 }
 0x43c   :  { %v458_v39 = vpop.f32.mrf.mxu1 }
 0x43d   :  { %v497_v47 = vmul.f32 %v489_v41, %v458_v39 }
 0x43e   :  { %v757_v40 = vpop.f32.mrf.mxu1 }
 0x43f   :  { %v505_v55 = vadd.f32 %v499_v50, %v497_v47  ;;  %v500_v56 = vmul.f32 %v757_v40, %v492_v48 }
 0x440   :  { %v461_v43 = vpop.f32.mrf.mxu1 }
 0x441   :  { %v498_v51 = vmul.f32 %v490_v7, %v461_v43 }
 0x443   :  { %v760_v46 = vpop.f32.mrf.mxu1  ;;  %v506_v59 = vadd.f32 %v500_v56, %v498_v51 }
 0x444   :  { %v503_v62 = vmul.f32 %v760_v46, %v495_v57 }
 0x445   :  { %v474_v49 = vpop.f32.mrf.mxu1 }
 0x446   :  { %v501_v52 = vmul.f32 %v493_v45, %v474_v49 }
 0x447   :  { %v761_v54 = vpop.f32.mrf.mxu1 }
 0x448   :  { %v507_v60 = vadd.f32 %v505_v55, %v501_v52  ;;  %v504_v63 = vmul.f32 %v761_v54, %v496_v58 }
 0x449   :  { %v477_v33 = vpop.f32.mrf.mxu1 }
 0x44a   :  { %v502_v61 = vmul.f32 %v494_v53, %v477_v33  ;;  %v509_v2 = vadd.f32 %v507_v60, %v503_v62 }
 0x44c   :  { %v508_v32 = vadd.f32 %v506_v59, %v502_v61 }
 0x44e   :  { %v510_v3 = vadd.f32 %v508_v32, %v504_v63 }
 0x450   :  { %v511_v4 = vpack.c.bf16 %v510_v3, %v509_v2 }
 0x452   :  { %767 = vmatmul.mubr.msk.bf16.vlgmr.msra.gmra.mxu0 %vm41_vm0, %v511_v4 }
 0x512   :  { %v572_v5 = vpop.f32.mrf.mxu0 }
 0x513   :  { %v573_v8 = vadd.f32 %v679_v35, %v572_v5 }
 0x514   :  { %v768_v6 = vpop.f32.mrf.mxu0 }
 0x515   :  { %v579_v11 = vmax.f32 %v573_v8, 0.0 }
 0x516   :  { %v575_v42 = vpop.f32.mrf.mxu0 }
 0x517   :  { %v576_v9 = vadd.f32 %v679_v35, %v575_v42 }
 0x518   :  { %v769_v10 = vpop.f32.mrf.mxu0 }
 0x519   :  { %v580_v12 = vmax.f32 %v576_v9, 0.0 }
 0x51b   :  { %v581_v13 = vpack.c.bf16 %v580_v12, %v579_v11 }
 0x51d   :  { %773 = vmatmul.mubr.msk.bf16.vlgmr.msra.gmra.mxu1 %vm315_vm2, %v581_v13 }
 0x5dd   :  { %v634_v14 = vpop.f32.mrf.mxu1 }
 0x5de   :  { %v635_v15 = vadd.f32 %v683_v28, %v634_v14 }
 0x5df   :  { %v774_v16 = vpop.f32.mrf.mxu1 }
 0x5e0   :  { %v641_v17 = vadd.f32 %v635_v15, %v920_v0 }
 0x5e1   :  { %v637_v18 = vpop.f32.mrf.mxu1 }
 0x5e2   :  { %643 = vst.msk [vmem:[#allocation2] sm:$0xff] %vm41_vm0, %v641_v17  ;;  %v638_v19 = vadd.f32 %v683_v28, %v637_v18 }
 0x5e3   :  { %v775_v20 = vpop.f32.mrf.mxu1 }
 0x5e4   :  { %v642_v21 = vadd.f32 %v638_v19, %v925_v1 }
 0x5e6   :  { %644 = vst.msk [vmem:[#allocation2 + $0x8] sm:$0xff] %vm41_vm0, %v642_v21 }
 0x5e7   :  { %845 = shalt.err (!%p842_p4)
}
 0x5e8   :  { %s860_s7 = smov 128   ;;  %s861_s2 = smov 8  }
 0x5e9   :  { %656 = dma.vmem_to_hbm [thread:$0]  %s651_s26, 256, %s1079_s10, [#allocation3], %s860_s7, %s860_s7, %s861_s2  }
 0x5ea   :  { %854 = dma.done.wait [#allocation3], 256  }
 0x5eb   :  { %855 = vsyncadd [#allocation3], 4294967040 }
 0x5ec   :  { %660 = vsyncpa [#allocation3], 1 }

</bundles_post_ra>
